<compile_context>
chip_gen: v7x
topology: tpu7x:2x2x1
jax: 0.10.0
libtpu: 0.0.40
codegen_flags: <defaults>
</compile_context>

<pallas_src>
import functools

import jax
import jax.numpy as jnp
from jax.experimental import pallas as pl
from jax.experimental.pallas import tpu as pltpu

# Walker2d-v2 dimensions (gym): obs_dim=17, act_dim=6
OBS_DIM = 17
ACT_DIM = 6
HIDDEN = 8

LANE = 128      # TPU lane width: weights / in-VMEM activations padded to this
SUBLANE = 8
ACT_PAD = 8     # HBM-side output width (act_dim=6 padded to 8 only)


def _round_up(n, m):
    return ((n + m - 1) // m) * m


def baseline_mlp_kernel(x_ref, w_ref, b_ref, o_ref, xs_ref):
    # One batch tile, whole 3-layer MLP fused; weight/bias slabs are VMEM-resident.
    # Widen x to 128 lanes inside VMEM only (pad lanes re-zeroed every step so this
    # is correct under megacore grid sharding).
    xs_ref[...] = jnp.zeros_like(xs_ref)
    xs_ref[:, 0:OBS_DIM] = x_ref[...]
    x = xs_ref[...]

    w1 = w_ref[0]
    w2 = w_ref[1]
    w3 = w_ref[2]
    b1 = b_ref[0:1, :]
    b2 = b_ref[1:2, :]
    b3 = b_ref[2:3, :]

    h1 = jnp.tanh(jnp.dot(x, w1, preferred_element_type=jnp.float32) + b1)
    h2 = jnp.tanh(jnp.dot(h1, w2, preferred_element_type=jnp.float32) + b2)
    y = jnp.dot(h2, w3, preferred_element_type=jnp.float32) + b3
    o_ref[...] = y[:, 0:ACT_PAD].astype(o_ref.dtype)


def pad_params(params):
    """Fuse the six parameters into one zero-padded weight slab and one bias slab."""
    w1, b1, w2, b2, w3, b3 = params

    def put(slab, a, idx):
        return slab.at[idx, : a.shape[0], : a.shape[1]].set(a)

    w_slab = jnp.zeros((3, LANE, LANE), jnp.float32)
    w_slab = put(w_slab, w1, 0)
    w_slab = put(w_slab, w2, 1)
    w_slab = put(w_slab, w3, 2)

    b_slab = jnp.zeros((3, LANE), jnp.float32)
    b_slab = b_slab.at[0, : b1.shape[1]].set(b1[0])
    b_slab = b_slab.at[1, : b2.shape[1]].set(b2[0])
    b_slab = b_slab.at[2, : b3.shape[1]].set(b3[0])
    return w_slab, b_slab


def _choose_tile(batch, tile_batch):
    pb8 = _round_up(batch, SUBLANE)
    tile_batch = max(SUBLANE, _round_up(tile_batch, SUBLANE))
    if pb8 <= tile_batch:
        # Split into (at least) two balanced tiles so both v7x TensorCores get work
        # on the "parallel" batch axis (no-op on single-core v5e/v6e).
        tb = max(SUBLANE, _round_up(pl.cdiv(pb8, 2), SUBLANE))
    else:
        tb = tile_batch
    pb = _round_up(pb8, tb)
    return tb, pb


def baseline_forward(x, padded_params, act_dim=ACT_DIM, tile_batch=1024):
    """x: [batch, obs_dim] f32.  padded_params: output of pad_params()."""
    w_slab, b_slab = padded_params
    batch, obs_dim = x.shape

    tb, pb = _choose_tile(batch, tile_batch)

    # Pad batch rows only; no lane padding in HBM.
    if pb != batch:
        xp = jnp.zeros((pb, obs_dim), x.dtype).at[:batch].set(x)
    else:
        xp = x

    full2 = lambda i: (0, 0)
    full3 = lambda i: (0, 0, 0)
    out = pl.pallas_call(
        baseline_mlp_kernel,
        out_shape=jax.ShapeDtypeStruct((pb, ACT_PAD), jnp.float32),
        grid=(pb // tb,),
        in_specs=[
            pl.BlockSpec((tb, obs_dim), lambda i: (i, 0)),     # x tile, narrow in HBM
            pl.BlockSpec((3, LANE, LANE), full3),              # weight slab (resident)
            pl.BlockSpec((3, LANE), full2),                    # bias slab (resident)
        ],
        out_specs=pl.BlockSpec((tb, ACT_PAD), lambda i: (i, 0)),
        scratch_shapes=[pltpu.VMEM((tb, LANE), jnp.float32)],  # lane-widened x (VMEM only)
        compiler_params=pltpu.CompilerParams(
            dimension_semantics=("parallel",),  # v7x: shard batch tiles across 2 TCs
        ),
    )(xp, w_slab, b_slab)

    return out[:batch, :act_dim]


def init_params(key, obs_dim, act_dim, hidden):
    # Deterministic init mirroring nn.Linear's U(-1/sqrt(fan_in), 1/sqrt(fan_in)).
    def linear(key, fan_in, fan_out):
        kw, kb = jax.random.split(key)
        bound = 1.0 / jnp.sqrt(jnp.float32(fan_in))
        w = jax.random.uniform(kw, (fan_in, fan_out), jnp.float32, -bound, bound)
        b = jax.random.uniform(kb, (1, fan_out), jnp.float32, -bound, bound)
        return w, b

    k1, k2, k3 = jax.random.split(key, 3)
    w1, b1 = linear(k1, obs_dim, hidden)
    w2, b2 = linear(k2, hidden, hidden)
    w3, b3 = linear(k3, hidden, act_dim)
    return (w1, b1, w2, b2, w3, b3)


def baseline_ref(x, params):
    w1, b1, w2, b2, w3, b3 = params
    h1 = jnp.tanh(x @ w1 + b1)
    h2 = jnp.tanh(h1 @ w2 + b2)
    return h2 @ w3 + b3


if __name__ == "__main__":
    key = jax.random.PRNGKey(0)
    kx, kp = jax.random.split(key)

    # Ragged batch: exercises batch-row padding and a (>=2)-step parallel grid.
    batch = 200
    x = jax.random.normal(kx, (batch, OBS_DIM), jnp.float32)
    params = init_params(kp, OBS_DIM, ACT_DIM, HIDDEN)
    padded_params = pad_params(params)

    fwd = jax.jit(functools.partial(baseline_forward, tile_batch=1024))
    out = jax.block_until_ready(fwd(x, padded_params))

    ref = baseline_ref(x, params)
    assert out.shape == (batch, ACT_DIM), out.shape
    assert jnp.allclose(out, ref, atol=1e-5, rtol=1e-5)

    print("KERNEL_OK")
</pallas_src>

<mosaic_0001>
module attributes {stable_mosaic.version = 11 : i64} {
  func.func @baseline_mlp_kernel(%arg0: i32, %arg1: memref<104x17xf32, #tpu.memory_space<vmem>>, %arg2: memref<3x128x128xf32, #tpu.memory_space<vmem>>, %arg3: memref<3x128xf32, #tpu.memory_space<vmem>>, %arg4: memref<104x8xf32, #tpu.memory_space<vmem>>, %arg5: memref<104x128xf32, #tpu.memory_space<vmem>>) attributes {dimension_semantics = [#tpu.dimension_semantics<parallel>], iteration_bounds = array<i64: 2>, scalar_prefetch = 0 : i64, scratch_operands = 1 : i64, tpu.core_type = #tpu.core_type<tc>, window_params = [{transform_indices = @transform_0, window_bounds = array<i64: 104, 17>}, {pipeline_mode = #tpu.pipeline_mode<synchronous>, transform_indices = @transform_1, window_bounds = array<i64: 3, 128, 128>}, {pipeline_mode = #tpu.pipeline_mode<synchronous>, transform_indices = @transform_2, window_bounds = array<i64: 3, 128>}, {transform_indices = @transform_3, window_bounds = array<i64: 104, 8>}]} {
    %cst = arith.constant 0.000000e+00 : f32
    %0 = vector.broadcast %cst : f32 to vector<104x128xf32>
    %c0 = arith.constant 0 : index
    %c0_0 = arith.constant 0 : index
    %1 = vector.load %arg5[%c0, %c0_0] : memref<104x128xf32, #tpu.memory_space<vmem>>, vector<104x128xf32>
    tpu.vector_store %arg5[%c0, %c0_0], %0 {strides = array<i32>} : memref<104x128xf32, #tpu.memory_space<vmem>>, vector<104x128xf32>,
    %c0_1 = arith.constant 0 : index
    %c0_2 = arith.constant 0 : index
    %2 = vector.load %arg1[%c0_1, %c0_2] : memref<104x17xf32, #tpu.memory_space<vmem>>, vector<104x17xf32>
    %c0_3 = arith.constant 0 : index
    %c0_4 = arith.constant 0 : index
    %3 = vector.load %arg5[%c0_3, %c0_4] : memref<104x128xf32, #tpu.memory_space<vmem>>, vector<104x17xf32>
    tpu.vector_store %arg5[%c0_3, %c0_4], %2 {strides = array<i32>} : memref<104x128xf32, #tpu.memory_space<vmem>>, vector<104x17xf32>,
    %c0_5 = arith.constant 0 : index
    %c0_6 = arith.constant 0 : index
    %4 = vector.load %arg5[%c0_5, %c0_6] : memref<104x128xf32, #tpu.memory_space<vmem>>, vector<104x128xf32>
    %c0_7 = arith.constant 0 : index
    %c0_8 = arith.constant 0 : index
    %c0_9 = arith.constant 0 : index
    %5 = vector.load %arg2[%c0_7, %c0_8, %c0_9] : memref<3x128x128xf32, #tpu.memory_space<vmem>>, vector<1x128x128xf32>
    %6 = vector.shape_cast %5 : vector<1x128x128xf32> to vector<128x128xf32>
    %c1 = arith.constant 1 : index
    %c0_10 = arith.constant 0 : index
    %c0_11 = arith.constant 0 : index
    %7 = vector.load %arg2[%c1, %c0_10, %c0_11] : memref<3x128x128xf32, #tpu.memory_space<vmem>>, vector<1x128x128xf32>
    %8 = vector.shape_cast %7 : vector<1x128x128xf32> to vector<128x128xf32>
    %c2 = arith.constant 2 : index
    %c0_12 = arith.constant 0 : index
    %c0_13 = arith.constant 0 : index
    %9 = vector.load %arg2[%c2, %c0_12, %c0_13] : memref<3x128x128xf32, #tpu.memory_space<vmem>>, vector<1x128x128xf32>
    %10 = vector.shape_cast %9 : vector<1x128x128xf32> to vector<128x128xf32>
    %c0_14 = arith.constant 0 : index
    %c0_15 = arith.constant 0 : index
    %11 = vector.load %arg3[%c0_14, %c0_15] : memref<3x128xf32, #tpu.memory_space<vmem>>, vector<1x128xf32>
    %c1_16 = arith.constant 1 : index
    %c0_17 = arith.constant 0 : index
    %12 = vector.load %arg3[%c1_16, %c0_17] : memref<3x128xf32, #tpu.memory_space<vmem>>, vector<1x128xf32>
    %c2_18 = arith.constant 2 : index
    %c0_19 = arith.constant 0 : index
    %13 = vector.load %arg3[%c2_18, %c0_19] : memref<3x128xf32, #tpu.memory_space<vmem>>, vector<1x128xf32>
    %cst_20 = arith.constant dense<0.000000e+00> : vector<104x128xf32>
    %14 = tpu.matmul %4, %6, %cst_20 {dimension_numbers = #tpu.dot_dimension_numbers<[1], [0], [0], [1], [0, 0, 1, 1], [], []>} : vector<104x128xf32>, vector<128x128xf32>, vector<104x128xf32> -> vector<104x128xf32>
    %15 = vector.broadcast %11 : vector<1x128xf32> to vector<104x128xf32>
    %16 = arith.addf %14, %15 : vector<104x128xf32>
    %17 = math.tanh %16 : vector<104x128xf32>
    %cst_21 = arith.constant dense<0.000000e+00> : vector<104x128xf32>
    %18 = tpu.matmul %17, %8, %cst_21 {dimension_numbers = #tpu.dot_dimension_numbers<[1], [0], [0], [1], [0, 0, 1, 1], [], []>} : vector<104x128xf32>, vector<128x128xf32>, vector<104x128xf32> -> vector<104x128xf32>
    %19 = vector.broadcast %12 : vector<1x128xf32> to vector<104x128xf32>
    %20 = arith.addf %18, %19 : vector<104x128xf32>
    %21 = math.tanh %20 : vector<104x128xf32>
    %cst_22 = arith.constant dense<0.000000e+00> : vector<104x128xf32>
    %22 = tpu.matmul %21, %10, %cst_22 {dimension_numbers = #tpu.dot_dimension_numbers<[1], [0], [0], [1], [0, 0, 1, 1], [], []>} : vector<104x128xf32>, vector<128x128xf32>, vector<104x128xf32> -> vector<104x128xf32>
    %23 = vector.broadcast %13 : vector<1x128xf32> to vector<104x128xf32>
    %24 = arith.addf %22, %23 : vector<104x128xf32>
    %25 = vector.extract_strided_slice %24 {offsets = [0, 0], sizes = [104, 8], strides = [1, 1]} : vector<104x128xf32> to vector<104x8xf32>
    %c0_23 = arith.constant 0 : index
    %c0_24 = arith.constant 0 : index
    %26 = vector.load %arg4[%c0_23, %c0_24] : memref<104x8xf32, #tpu.memory_space<vmem>>, vector<104x8xf32>
    tpu.vector_store %arg4[%c0_23, %c0_24], %25 {strides = array<i32>} : memref<104x8xf32, #tpu.memory_space<vmem>>, vector<104x8xf32>,
    return
  }
  func.func @transform_0(%arg0: i32) -> (i32, i32) {
    %c0_i32 = arith.constant 0 : i32
    %c0_i32_0 = arith.constant 0 : i32
    return %arg0, %c0_i32 : i32, i32
  }
  func.func @transform_1(%arg0: i32) -> (i32, i32, i32) {
    %c0_i32 = arith.constant 0 : i32
    %c0_i32_0 = arith.constant 0 : i32
    %c0_i32_1 = arith.constant 0 : i32
    %c0_i32_2 = arith.constant 0 : i32
    return %c0_i32, %c0_i32_0, %c0_i32_1 : i32, i32, i32
  }
  func.func @transform_2(%arg0: i32) -> (i32, i32) {
    %c0_i32 = arith.constant 0 : i32
    %c0_i32_0 = arith.constant 0 : i32
    %c0_i32_1 = arith.constant 0 : i32
    return %c0_i32, %c0_i32_0 : i32, i32
  }
  func.func @transform_3(%arg0: i32) -> (i32, i32) {
    %c0_i32 = arith.constant 0 : i32
    %c0_i32_0 = arith.constant 0 : i32
    return %arg0, %c0_i32 : i32, i32
  }
}

</mosaic_0001>

<bundles_post_ra>
// kernel: baseline_forward.1
= control target key start
LH: loop header
LB: loop body
LE: loop exit
PB: predicated region body
PF: predicated region fallthrough
CT: control target
= control target key end

     0   :  { %s1304_s12 = smov 0   ;;  %s1690_s0 = inlined_call_operand.vmem [shape: f32[208,17], index: 0, kind: input, shape index: {}]   ;;  %s1691_s1 = inlined_call_operand.vmem [shape: f32[3,128,128], index: 1, kind: input, shape index: {}]   ;;  %s1692_s2 = inlined_call_operand.vmem [shape: f32[3,128], index: 2, kind: input, shape index: {}]   ;;  %s1693_s3 = inlined_call_operand.vmem [shape: f32[208,8], index: 3, kind: output, shape index: {}]  }
   0x1 LB: > { %s778_s13 = sadd.s32 4294967295, %s1279_s12   ;;  %p782_p0 = scmp.ge.s32.totalorder %s1279_s12, 1  ;;  %s1279_s12 = sphi %s1304_s12, %s13_s12  }
   0x2   : > { %p138_p1 = scmp.lt.s32.totalorder %s1279_s12, 3 }
   0x4   : > { %p139_p2 = pnand %p782_p0, %p138_p1 }
   0x5   : > { %v227_v0 = vld [vmem:[%s1691_s1] sm:$0xff] (!%p139_p2)  ;;  %v228_v1 = vld [vmem:[%s1691_s1 + $0x8] sm:$0xff] (!%p139_p2)  ;;  %v229_v2 = vld [vmem:[%s1691_s1 + $0x10] sm:$0xff] (!%p139_p2)  ;;  %v1281_v3 = vmov (!%p139_p2), 0.0|0.0   ;;  %vm1282_vm0 = vmmov (!%p139_p2), 0   ;;  %v1283_v6 = vmov (!%p139_p2), 0.0  }
   0x6   : > { %142 = sbr.rel (%p139_p2) target bundleno = 752 (0x2f0), region = 32  ;;  %1122 = vmatprep.subr.bf16.mxu0 (!%p139_p2), %v1281_v3  ;;  %v1123_v4 = vpack.c.bf16 (!%p139_p2), %v228_v1, %v227_v0  ;;  %v230_v5 = vld [vmem:[%s1691_s1 + $0x18] sm:$0xff] (!%p139_p2)  ;;  %941 = vmatprep.mubr.msk.f32.mxu0 (!%p139_p2), %vm1282_vm0, %v1283_v6  ;;  %174 = vst [vmem:[#allocation2] sm:$0xff] (!%p139_p2), %v1283_v6  ;;  %175 = vst [vmem:[#allocation2 + $0x8] sm:$0xff] (!%p139_p2), %v1283_v6  ;;  %v231_v8 = vld [vmem:[%s1691_s1 + $0x20] sm:$0xff] (!%p139_p2)  ;;  %vm200_vm1 = vcmask (!%p139_p2), 138240  }
   0x7   : > { %176 = vst [vmem:[#allocation2 + $0x10] sm:$0xff] (!%p139_p2), %v1283_v6  ;;  %177 = vst [vmem:[#allocation2 + $0x18] sm:$0xff] (!%p139_p2), %v1283_v6  ;;  %s162_s22 = smul.u32 (!%p139_p2), 13, %s778_s13  ;;  %1146 = vmatprep.subr.bf16.mxu1 (!%p139_p2), %v1281_v3  ;;  %1012 = vmatprep.mubr.msk.f32.mxu1 (!%p139_p2), %vm1282_vm0, %v1283_v6  ;;  %v1126_v7 = vpack.c.bf16 (!%p139_p2), %v230_v5, %v229_v2  ;;  %v232_v9 = vld [vmem:[%s1691_s1 + $0x28] sm:$0xff] (!%p139_p2)  ;;  %v785_v10 = vld [vmem:[%s1691_s1 + $0x80] sm:$0xff] (!%p139_p2)  ;;  %vm708_vm2 = vcmask (!%p139_p2), 64512  }
   0x8   : > { %178 = vst [vmem:[#allocation2 + $0x20] sm:$0xff] (!%p139_p2), %v1283_v6  ;;  %179 = vst [vmem:[#allocation2 + $0x28] sm:$0xff] (!%p139_p2), %v1283_v6  ;;  %1124 = vmatpush3.bf16.msra.mxu0 (!%p139_p2), %v1123_v4  ;;  %v786_v11 = vld [vmem:[%s1691_s1 + $0x88] sm:$0xff] (!%p139_p2)  ;;  %v787_v13 = vld [vmem:[%s1691_s1 + $0x90] sm:$0xff] (!%p139_p2)  ;;  %v1129_v15 = vpack.c.bf16 (!%p139_p2), %v232_v9, %v231_v8 }
   0x9   : > { %180 = vst [vmem:[#allocation2 + $0x30] sm:$0xff] (!%p139_p2), %v1283_v6  ;;  %181 = vst [vmem:[#allocation2 + $0x38] sm:$0xff] (!%p139_p2), %v1283_v6  ;;  %p163_p3 = scmp.lt.s32.totalorder (!%p139_p2), %s162_s22, 25  ;;  %1125 = vmatprep.subr.bf16.mxu0 (!%p139_p2), %v1281_v3  ;;  %v1147_v12 = vpack.c.bf16 (!%p139_p2), %v786_v11, %v785_v10  ;;  %v788_v14 = vld [vmem:[%s1691_s1 + $0x98] sm:$0xff] (!%p139_p2)  ;;  %v233_v16 = vld [vmem:[%s1691_s1 + $0x30] sm:$0xff] (!%p139_p2) }
   0xa   : > { %182 = vst [vmem:[#allocation2 + $0x40] sm:$0xff] (!%p139_p2), %v1283_v6  ;;  %183 = vst [vmem:[#allocation2 + $0x48] sm:$0xff] (!%p139_p2), %v1283_v6  ;;  %v234_v17 = vld [vmem:[%s1691_s1 + $0x38] sm:$0xff] (!%p139_p2)  ;;  %v1150_v18 = vpack.c.bf16 (!%p139_p2), %v788_v14, %v787_v13  ;;  %v789_v19 = vld [vmem:[%s1691_s1 + $0xa0] sm:$0xff] (!%p139_p2) }
   0xb   : > { %184 = vst [vmem:[#allocation2 + $0x50] sm:$0xff] (!%p139_p2), %v1283_v6  ;;  %185 = vst [vmem:[#allocation2 + $0x58] sm:$0xff] (!%p139_p2), %v1283_v6  ;;  %1148 = vmatpush3.bf16.msra.mxu1 (!%p139_p2), %v1147_v12  ;;  %v790_v20 = vld [vmem:[%s1691_s1 + $0xa8] sm:$0xff] (!%p139_p2)  ;;  %v235_v24 = vld [vmem:[%s1691_s1 + $0x40] sm:$0xff] (!%p139_p2)  ;;  %v1132_v29 = vpack.c.bf16 (!%p139_p2), %v234_v17, %v233_v16 }
   0xc   : > { %186 = vst [vmem:[#allocation2 + $0x60] sm:$0xff] (!%p139_p2), %v1283_v6  ;;  %1127 = vmatpush3.bf16.msra.mxu0 (!%p139_p2), %v1126_v7  ;;  %1149 = vmatprep.subr.bf16.mxu1 (!%p139_p2), %v1281_v3  ;;  %v236_v25 = vld [vmem:[%s1691_s1 + $0x48] sm:$0xff] (!%p139_p2)  ;;  %v1153_v36 = vpack.c.bf16 (!%p139_p2), %v790_v20, %v789_v19  ;;  %v791_v38 = vld [vmem:[%s1691_s1 + $0xb0] sm:$0xff] (!%p139_p2)  ;;  %v792_v39 = vld [vmem:[%s1691_s1 + $0xb8] sm:$0xff] (!%p139_p2) }
   0xd   : > { %s1695_s22 = smov (!%p163_p3, %s162_s22), 25  ;;  %1128 = vmatprep.subr.bf16.mxu0 %v1281_v3  ;;  %v1135_v40 = vpack.c.bf16 %v236_v25, %v235_v24  ;;  %v237_v41 = vld [vmem:[%s1691_s1 + $0x50] sm:$0xff]  ;;  %v238_v42 = vld [vmem:[%s1691_s1 + $0x58] sm:$0xff]  ;;  %v1156_v43 = vpack.c.bf16 %v792_v39, %v791_v38  ;;  %v793_v44 = vld [vmem:[%s1691_s1 + $0xc0] sm:$0xff] }
   0xe   : > { %s783_s10 = sshll.u32 %s1695_s22, 3  ;;  %v794_v45 = vld [vmem:[%s1691_s1 + $0xc8] sm:$0xff]  ;;  %v1138_v46 = vpack.c.bf16 %v238_v42, %v237_v41  ;;  %v239_v47 = vld [vmem:[%s1691_s1 + $0x60] sm:$0xff]  ;;  %v241_v51 = vld [vmem:[%s1691_s1 + $0x70] sm:$0xff] }
   0xf   : > { %s1377_s16 = scalar_lea.vmem %s1690_s0, %s783_s10  ;;  %1151 = vmatpush3.bf16.msra.mxu1 %v1150_v18  ;;  %v240_v48 = vld [vmem:[%s1691_s1 + $0x68] sm:$0xff]  ;;  %v1159_v49 = vpack.c.bf16 %v794_v45, %v793_v44  ;;  %v242_v52 = vld [vmem:[%s1691_s1 + $0x78] sm:$0xff]  ;;  %v795_v4 = vld [vmem:[%s1691_s1 + $0xd0] sm:$0xff]  ;;  %s1659_s26 = scalar_lea.vmem %s1693_s3, %s783_s10 }
  0x10   : > { %v187_v21 = vld [vmem:[%s1377_s16] sm:$0xff]  ;;  %v188_v22 = vld [vmem:[%s1377_s16 + $0x8] sm:$0xff]  ;;  %v189_v23 = vld [vmem:[%s1377_s16 + $0x10] sm:$0xff]  ;;  %1130 = vmatpush3.bf16.msra.mxu0 %v1129_v15  ;;  %1152 = vmatprep.subr.bf16.mxu1 %v1281_v3  ;;  %v1141_v50 = vpack.c.bf16 %v240_v48, %v239_v47  ;;  %v1144_v53 = vpack.c.bf16 %v242_v52, %v241_v51 }
  0x11   : > { %201 = vst.msk [vmem:[#allocation2] sm:$0xff] %vm200_vm1, %v187_v21  ;;  %202 = vst.msk [vmem:[#allocation2 + $0x8] sm:$0xff] %vm200_vm1, %v188_v22  ;;  %v190_v26 = vld [vmem:[%s1377_s16 + $0x18] sm:$0xff]  ;;  %v191_v27 = vld [vmem:[%s1377_s16 + $0x20] sm:$0xff]  ;;  %1131 = vmatprep.subr.bf16.mxu0 %v1281_v3 }
  0x12   : > { %203 = vst.msk [vmem:[#allocation2 + $0x10] sm:$0xff] %vm200_vm1, %v189_v23  ;;  %v192_v28 = vld [vmem:[%s1377_s16 + $0x28] sm:$0xff]  ;;  %204 = vst.msk [vmem:[#allocation2 + $0x18] sm:$0xff] %vm200_vm1, %v190_v26  ;;  %v193_v30 = vld [vmem:[%s1377_s16 + $0x30] sm:$0xff] }
  0x13   : > { %205 = vst.msk [vmem:[#allocation2 + $0x20] sm:$0xff] %vm200_vm1, %v191_v27  ;;  %206 = vst.msk [vmem:[#allocation2 + $0x28] sm:$0xff] %vm200_vm1, %v192_v28  ;;  %v194_v31 = vld [vmem:[%s1377_s16 + $0x38] sm:$0xff]  ;;  %v195_v32 = vld [vmem:[%s1377_s16 + $0x40] sm:$0xff]  ;;  %1154 = vmatpush3.bf16.msra.mxu1 %v1153_v36 }
  0x14   : > { %207 = vst.msk [vmem:[#allocation2 + $0x30] sm:$0xff] %vm200_vm1, %v193_v30  ;;  %208 = vst.msk [vmem:[#allocation2 + $0x38] sm:$0xff] %vm200_vm1, %v194_v31  ;;  %v196_v33 = vld [vmem:[%s1377_s16 + $0x48] sm:$0xff]  ;;  %v197_v34 = vld [vmem:[%s1377_s16 + $0x50] sm:$0xff]  ;;  %1133 = vmatpush3.bf16.msra.mxu0 %v1132_v29  ;;  %1155 = vmatprep.subr.bf16.mxu1 %v1281_v3 }
  0x15   : > { %209 = vst.msk [vmem:[#allocation2 + $0x40] sm:$0xff] %vm200_vm1, %v195_v32  ;;  %v198_v35 = vld [vmem:[%s1377_s16 + $0x58] sm:$0xff]  ;;  %210 = vst.msk [vmem:[#allocation2 + $0x48] sm:$0xff] %vm200_vm1, %v196_v33  ;;  %v199_v37 = vld [vmem:[%s1377_s16 + $0x60] sm:$0xff]  ;;  %1134 = vmatprep.subr.bf16.mxu0 %v1281_v3 }
  0x16   : > { %211 = vst.msk [vmem:[#allocation2 + $0x50] sm:$0xff] %vm200_vm1, %v197_v34  ;;  %212 = vst.msk [vmem:[#allocation2 + $0x58] sm:$0xff] %vm200_vm1, %v198_v35  ;;  %v796_v5 = vld [vmem:[%s1691_s1 + $0xd8] sm:$0xff]  ;;  %v797_v8 = vld [vmem:[%s1691_s1 + $0xe0] sm:$0xff] }
  0x17   : > { %213 = vst.msk [vmem:[#allocation2 + $0x60] sm:$0xff] %vm200_vm1, %v199_v37  ;;  %1157 = vmatpush3.bf16.msra.mxu1 %v1156_v43  ;;  %v1162_v7 = vpack.c.bf16 %v796_v5, %v795_v4  ;;  %v798_v9 = vld [vmem:[%s1691_s1 + $0xe8] sm:$0xff]  ;;  %v799_v11 = vld [vmem:[%s1691_s1 + $0xf0] sm:$0xff]  ;;  %v800_v12 = vld [vmem:[%s1691_s1 + $0xf8] sm:$0xff] }
  0x18   : > { %1136 = vmatpush3.bf16.msra.mxu0 %v1135_v40  ;;  %1158 = vmatprep.subr.bf16.mxu1 %v1281_v3  ;;  %v214_v54 = vld [vmem:[#allocation2] sm:$0xff]  ;;  %v215_v55 = vld [vmem:[#allocation2 + $0x8] sm:$0xff]  ;;  %v1165_v10 = vpack.c.bf16 %v798_v9, %v797_v8  ;;  %v1168_v13 = vpack.c.bf16 %v800_v12, %v799_v11  ;;  %v803_v16 = vld [vmem:[%s1691_s1 + $0x110] sm:$0xff] }
  0x19   : > { %1137 = vmatprep.subr.bf16.mxu0 %v1281_v3  ;;  %v216_v56 = vld [vmem:[#allocation2 + $0x10] sm:$0xff]  ;;  %v217_v57 = vld [vmem:[#allocation2 + $0x18] sm:$0xff]  ;;  %v801_v14 = vld [vmem:[%s1691_s1 + $0x100] sm:$0xff] }
  0x1a   : > { %v218_v58 = vld [vmem:[#allocation2 + $0x20] sm:$0xff]  ;;  %v219_v59 = vld [vmem:[#allocation2 + $0x28] sm:$0xff]  ;;  %v804_v18 = vld [vmem:[%s1691_s1 + $0x118] sm:$0xff] }
  0x1b   : > { %1160 = vmatpush3.bf16.msra.mxu1 %v1159_v49  ;;  %v220_v60 = vld [vmem:[#allocation2 + $0x30] sm:$0xff]  ;;  %v221_v61 = vld [vmem:[#allocation2 + $0x38] sm:$0xff]  ;;  %v802_v15 = vld [vmem:[%s1691_s1 + $0x108] sm:$0xff]  ;;  %v1174_v19 = vpack.c.bf16 %v804_v18, %v803_v16 }
  0x1c   : > { %1139 = vmatpush3.bf16.msra.mxu0 %v1138_v46  ;;  %1161 = vmatprep.subr.bf16.mxu1 %v1281_v3  ;;  %v222_v62 = vld [vmem:[#allocation2 + $0x40] sm:$0xff]  ;;  %v223_v63 = vld [vmem:[#allocation2 + $0x48] sm:$0xff]  ;;  %v1171_v17 = vpack.c.bf16 %v802_v15, %v801_v14  ;;  %v807_v23 = vld [vmem:[%s1691_s1 + $0x130] sm:$0xff] }
  0x1d   : > { %1140 = vmatprep.subr.bf16.mxu0 %v1281_v3  ;;  %v224_v0 = vld [vmem:[#allocation2 + $0x50] sm:$0xff]  ;;  %v225_v1 = vld [vmem:[#allocation2 + $0x58] sm:$0xff]  ;;  %v805_v20 = vld [vmem:[%s1691_s1 + $0x120] sm:$0xff] }
  0x1e   : > { %v226_v2 = vld [vmem:[#allocation2 + $0x60] sm:$0xff]  ;;  %v806_v21 = vld [vmem:[%s1691_s1 + $0x128] sm:$0xff]  ;;  %v808_v24 = vld [vmem:[%s1691_s1 + $0x138] sm:$0xff] }
  0x1f   : > { %1163 = vmatpush3.bf16.msra.mxu1 %v1162_v7  ;;  %v1177_v22 = vpack.c.bf16 %v806_v21, %v805_v20  ;;  %v1180_v25 = vpack.c.bf16 %v808_v24, %v807_v23  ;;  %v809_v26 = vld [vmem:[%s1691_s1 + $0x140] sm:$0xff]  ;;  %v810_v27 = vld [vmem:[%s1691_s1 + $0x148] sm:$0xff]  ;;  %v811_v20 = vld [vmem:[%s1691_s1 + $0x150] sm:$0xff] }
  0x20   : > { %1142 = vmatpush3.bf16.msra.mxu0 %v1141_v50  ;;  %1164 = vmatprep.subr.bf16.mxu1 %v1281_v3  ;;  %v1183_v28 = vpack.c.bf16 %v810_v27, %v809_v26  ;;  %v1543_v29 = vld [vmem:[%s1692_s2] ss:$0 sm:$0xff]  ;;  %v812_v21 = vld [vmem:[%s1691_s1 + $0x158] sm:$0xff]  ;;  %v814_v24 = vld [vmem:[%s1691_s1 + $0x168] sm:$0xff] }
  0x21   : > { %1143 = vmatprep.subr.bf16.mxu0 %v1281_v3  ;;  %v813_v23 = vld [vmem:[%s1691_s1 + $0x160] sm:$0xff]  ;;  %v815_v26 = vld [vmem:[%s1691_s1 + $0x170] sm:$0xff]  ;;  %v816_v27 = vld [vmem:[%s1691_s1 + $0x178] sm:$0xff] }
  0x23   : > { %1166 = vmatpush3.bf16.msra.mxu1 %v1165_v10 }
  0x24   : > { %1145 = vmatpush3.bf16.msra.mxu0 %v1144_v53  ;;  %1167 = vmatprep.subr.bf16.mxu1 %v1281_v3 }
  0x25   : > { %1170 = vmatprep.subr.bf16.mxu0 %v1281_v3 }
  0x27   : > { %942 = vmatmul.mubr.f32.vlgmr.msra.gmra.mrb[0].mxu0 %v214_v54  ;;  %1169 = vmatpush3.bf16.msra.mxu1 %v1168_v13 }
  0x28   : > { %944 = vmatprep.mubr.msk.f32.mxu0 %vm1282_vm0, %v1283_v6  ;;  %1194 = vmatprep.subr.bf16.mxu1 %v1281_v3 }
  0x29   : > { %1172 = vmatpush3.bf16.msra.mxu0 %v1171_v17 }
  0x2a   : > { %1173 = vmatprep.subr.bf16.mxu0 %v1281_v3 }
  0x2b   : > { %945 = vmatmul.mubr.f32.gmra.mrb[2].mxu0 %v215_v55 }
  0x2c   : > { %947 = vmatprep.mubr.msk.f32.mxu0 %vm1282_vm0, %v1283_v6 }
  0x2d   : > { %1175 = vmatpush3.bf16.msra.mxu0 %v1174_v19 }
  0x2e   : > { %1176 = vmatprep.subr.bf16.mxu0 %v1281_v3 }
  0x2f   : > { %948 = vmatmul.mubr.f32.gmra.mrb[4].mxu0 %v216_v56 }
  0x30   : > { %950 = vmatprep.mubr.msk.f32.mxu0 %vm1282_vm0, %v1283_v6 }
  0x31   : > { %1178 = vmatpush3.bf16.msra.mxu0 %v1177_v22 }
  0x32   : > { %1179 = vmatprep.subr.bf16.mxu0 %v1281_v3 }
  0x33   : > { %951 = vmatmul.mubr.f32.gmra.mrb[6].mxu0 %v217_v57 }
  0x34   : > { %953 = vmatprep.mubr.msk.f32.mxu0 %vm1282_vm0, %v1283_v6 }
  0x35   : > { %1181 = vmatpush3.bf16.msra.mxu0 %v1180_v25 }
  0x36   : > { %1182 = vmatprep.subr.bf16.mxu0 %v1281_v3 }
  0x37   : > { %954 = vmatmul.mubr.f32.gmra.mrb[8].mxu0 %v218_v58 }
  0x38   : > { %956 = vmatprep.mubr.msk.f32.mxu0 %vm1282_vm0, %v1283_v6 }
  0x39   : > { %1184 = vmatpush3.bf16.msra.mxu0 %v1183_v28 }
  0x3a   : > { %1185 = vmatprep.subr.bf16.mxu0 %v1281_v3 }
  0x3b   : > { %957 = vmatmul.mubr.f32.gmra.mrb[10].mxu0 %v219_v59 }
  0x3c   : > { %959 = vmatprep.mubr.msk.f32.mxu0 %vm1282_vm0, %v1283_v6 }
  0x3f   : > { %960 = vmatmul.mubr.f32.gmra.mrb[12].mxu0 %v220_v60 }
  0x40   : > { %962 = vmatprep.mubr.msk.f32.mxu0 %vm1282_vm0, %v1283_v6 }
  0x43   : > { %963 = vmatmul.mubr.f32.gmra.mrb[14].mxu0 %v221_v61 }
  0x44   : > { %965 = vmatprep.mubr.msk.f32.mxu0 %vm1282_vm0, %v1283_v6 }
  0x47   : > { %966 = vmatmul.mubr.f32.gmra.mrb[16].mxu0 %v222_v62 }
  0x48   : > { %968 = vmatprep.mubr.msk.f32.mxu0 %vm1282_vm0, %v1283_v6 }
  0x4b   : > { %969 = vmatmul.mubr.f32.gmra.mrb[18].mxu0 %v223_v63 }
  0x4c   : > { %971 = vmatprep.mubr.msk.f32.mxu0 %vm1282_vm0, %v1283_v6 }
  0x4f   : > { %972 = vmatmul.mubr.f32.gmra.mrb[20].mxu0 %v224_v0 }
  0x50   : > { %974 = vmatprep.mubr.msk.f32.mxu0 %vm1282_vm0, %v1283_v6 }
  0x53   : > { %975 = vmatmul.mubr.f32.gmra.mrb[22].mxu0 %v225_v1 }
  0x54   : > { %977 = vmatprep.mubr.msk.f32.mxu0 %vm1282_vm0, %v1283_v6 }
  0x57   : > { %978 = vmatmul.mubr.f32.gmra.mrb[24].mxu0 %v226_v2 }
  0x58   : > { %1083 = vmatprep.mubr.msk.f32.mxu0 %vm1282_vm0, %v1283_v6 }
  0xfa   : > { %v350_v30 = vpop.f32.mrb[0].mxu0 }
  0xfb   : > { %v351_v31 = vadd.f32 %v1543_v29, %v350_v30  ;;  %v943_v32 = vpop.f32.mrb[1].mxu0 }
  0xfd   : > { %1221 = vtanh.f32 %v351_v31 }
  0xfe   : > { %v355_v33 = vpop.f32.mrb[2].mxu0 }
  0xff   : > { %v356_v34 = vadd.f32 %v1543_v29, %v355_v33  ;;  %v946_v35 = vpop.f32.mrb[3].mxu0 }
 0x101   : > { %1223 = vtanh.f32 %v356_v34 }
 0x102   : > { %v360_v36 = vpop.f32.mrb[4].mxu0 }
 0x103   : > { %v361_v37 = vadd.f32 %v1543_v29, %v360_v36  ;;  %v949_v38 = vpop.f32.mrb[5].mxu0 }
 0x105   : > { %1225 = vtanh.f32 %v361_v37 }
 0x106   : > { %v365_v39 = vpop.f32.mrb[6].mxu0 }
 0x107   : > { %v1222_v40 = vpop.eup %1221  ;;  %v366_v41 = vadd.f32 %v1543_v29, %v365_v39  ;;  %v952_v42 = vpop.f32.mrb[7].mxu0 }
 0x108   : > { %1013 = vmatmul.mubr.f32.vlgmr.msra.gmra.mrb[0].mxu1 %v1222_v40 }
 0x109   : > { %1227 = vtanh.f32 %v366_v41  ;;  %1015 = vmatprep.mubr.msk.f32.mxu1 %vm1282_vm0, %v1283_v6  ;;  %1202 = vmatpush3.bf16.msra.mxu1 %v1171_v17 }
 0x10a   : > { %v370_v43 = vpop.f32.mrb[8].mxu0  ;;  %1195 = vmatprep.subr.bf16.mxu1 %v1281_v3 }
 0x10b   : > { %v1224_v44 = vpop.eup %1223  ;;  %v371_v45 = vadd.f32 %v1543_v29, %v370_v43  ;;  %v955_v46 = vpop.f32.mrb[9].mxu0 }
 0x10c   : > { %1016 = vmatmul.mubr.f32.gmra.mrb[2].mxu1 %v1224_v44 }
 0x10d   : > { %1229 = vtanh.f32 %v371_v45  ;;  %1018 = vmatprep.mubr.msk.f32.mxu1 %vm1282_vm0, %v1283_v6  ;;  %1203 = vmatpush3.bf16.msra.mxu1 %v1174_v19 }
 0x10e   : > { %v375_v47 = vpop.f32.mrb[10].mxu0  ;;  %1196 = vmatprep.subr.bf16.mxu1 %v1281_v3 }
 0x10f   : > { %v1226_v48 = vpop.eup %1225  ;;  %v376_v49 = vadd.f32 %v1543_v29, %v375_v47  ;;  %v958_v50 = vpop.f32.mrb[11].mxu0 }
 0x110   : > { %1019 = vmatmul.mubr.f32.gmra.mrb[4].mxu1 %v1226_v48 }
 0x111   : > { %1231 = vtanh.f32 %v376_v49  ;;  %1021 = vmatprep.mubr.msk.f32.mxu1 %vm1282_vm0, %v1283_v6  ;;  %1204 = vmatpush3.bf16.msra.mxu1 %v1177_v22  ;;  %v1186_v22 = vpack.c.bf16 %v812_v21, %v811_v20 }
 0x112   : > { %v380_v51 = vpop.f32.mrb[12].mxu0  ;;  %1197 = vmatprep.subr.bf16.mxu1 %v1281_v3 }
 0x113   : > { %v1228_v52 = vpop.eup %1227  ;;  %v381_v53 = vadd.f32 %v1543_v29, %v380_v51  ;;  %v961_v54 = vpop.f32.mrb[13].mxu0  ;;  %1187 = vmatpush3.bf16.msra.mxu0 %v1186_v22 }
 0x114   : > { %1022 = vmatmul.mubr.f32.gmra.mrb[6].mxu1 %v1228_v52  ;;  %1188 = vmatprep.subr.bf16.mxu0 %v1281_v3 }
 0x115   : > { %1233 = vtanh.f32 %v381_v53  ;;  %1024 = vmatprep.mubr.msk.f32.mxu1 %vm1282_vm0, %v1283_v6  ;;  %1205 = vmatpush3.bf16.msra.mxu1 %v1180_v25  ;;  %v1189_v25 = vpack.c.bf16 %v814_v24, %v813_v23 }
 0x116   : > { %v385_v55 = vpop.f32.mrb[14].mxu0  ;;  %1198 = vmatprep.subr.bf16.mxu1 %v1281_v3 }
 0x117   : > { %v1230_v56 = vpop.eup %1229  ;;  %v386_v57 = vadd.f32 %v1543_v29, %v385_v55  ;;  %v964_v58 = vpop.f32.mrb[15].mxu0  ;;  %1190 = vmatpush3.bf16.msra.mxu0 %v1189_v25 }
 0x118   : > { %1025 = vmatmul.mubr.f32.gmra.mrb[8].mxu1 %v1230_v56  ;;  %1191 = vmatprep.subr.bf16.mxu0 %v1281_v3 }
 0x119   : > { %1235 = vtanh.f32 %v386_v57  ;;  %1027 = vmatprep.mubr.msk.f32.mxu1 %vm1282_vm0, %v1283_v6  ;;  %1206 = vmatpush3.bf16.msra.mxu1 %v1183_v28  ;;  %v1192_v28 = vpack.c.bf16 %v816_v27, %v815_v26 }
 0x11a   : > { %v390_v59 = vpop.f32.mrb[16].mxu0  ;;  %1199 = vmatprep.subr.bf16.mxu1 %v1281_v3 }
 0x11b   : > { %v1232_v60 = vpop.eup %1231  ;;  %v391_v61 = vadd.f32 %v1543_v29, %v390_v59  ;;  %v967_v62 = vpop.f32.mrb[17].mxu0  ;;  %1193 = vmatpush3.bf16.msra.mxu0 %v1192_v28 }
 0x11c   : > { %1028 = vmatmul.mubr.f32.gmra.mrb[10].mxu1 %v1232_v60 }
 0x11d   : > { %1237 = vtanh.f32 %v391_v61  ;;  %1030 = vmatprep.mubr.msk.f32.mxu1 %vm1282_vm0, %v1283_v6  ;;  %1207 = vmatpush3.bf16.msra.mxu1 %v1186_v22 }
 0x11e   : > { %v395_v63 = vpop.f32.mrb[18].mxu0  ;;  %1200 = vmatprep.subr.bf16.mxu1 %v1281_v3 }
 0x11f   : > { %v1234_v0 = vpop.eup %1233  ;;  %v396_v1 = vadd.f32 %v1543_v29, %v395_v63  ;;  %v970_v2 = vpop.f32.mrb[19].mxu0 }
 0x120   : > { %1031 = vmatmul.mubr.f32.gmra.mrb[12].mxu1 %v1234_v0 }
 0x121   : > { %1239 = vtanh.f32 %v396_v1  ;;  %1033 = vmatprep.mubr.msk.f32.mxu1 %vm1282_vm0, %v1283_v6  ;;  %1208 = vmatpush3.bf16.msra.mxu1 %v1189_v25 }
 0x122   : > { %v400_v4 = vpop.f32.mrb[20].mxu0  ;;  %1201 = vmatprep.subr.bf16.mxu1 %v1281_v3 }
 0x123   : > { %v1236_v5 = vpop.eup %1235  ;;  %v401_v7 = vadd.f32 %v1543_v29, %v400_v4  ;;  %v973_v8 = vpop.f32.mrb[21].mxu0 }
 0x124   : > { %1034 = vmatmul.mubr.f32.gmra.mrb[14].mxu1 %v1236_v5 }
 0x125   : > { %1241 = vtanh.f32 %v401_v7  ;;  %1036 = vmatprep.mubr.msk.f32.mxu1 %vm1282_vm0, %v1283_v6  ;;  %1209 = vmatpush3.bf16.msra.mxu1 %v1192_v28 }
 0x126   : > { %v405_v9 = vpop.f32.mrb[22].mxu0 }
 0x127   : > { %v1238_v10 = vpop.eup %1237  ;;  %v406_v11 = vadd.f32 %v1543_v29, %v405_v9  ;;  %v976_v12 = vpop.f32.mrb[23].mxu0 }
 0x128   : > { %1037 = vmatmul.mubr.f32.gmra.mrb[16].mxu1 %v1238_v10 }
 0x129   : > { %1243 = vtanh.f32 %v406_v11  ;;  %1039 = vmatprep.mubr.msk.f32.mxu1 %vm1282_vm0, %v1283_v6 }
 0x12a   : > { %v410_v13 = vpop.f32.mrb[24].mxu0 }
 0x12b   : > { %v1240_v14 = vpop.eup %1239  ;;  %v411_v15 = vadd.f32 %v1543_v29, %v410_v13  ;;  %v979_v16 = vpop.f32.mrb[25].mxu0  ;;  %v1614_v29 = vld [vmem:[%s1692_s2 + $0x1] ss:$0 sm:$0xff] }
 0x12c   : > { %1040 = vmatmul.mubr.f32.gmra.mrb[18].mxu1 %v1240_v14 }
 0x12d   : > { %1245 = vtanh.f32 %v411_v15  ;;  %1042 = vmatprep.mubr.msk.f32.mxu1 %vm1282_vm0, %v1283_v6 }
 0x12f   : > { %v1242_v17 = vpop.eup %1241 }
 0x130   : > { %1043 = vmatmul.mubr.f32.gmra.mrb[20].mxu1 %v1242_v17 }
 0x131   : > { %1045 = vmatprep.mubr.msk.f32.mxu1 %vm1282_vm0, %v1283_v6 }
 0x133   : > { %v1244_v18 = vpop.eup %1243 }
 0x134   : > { %1046 = vmatmul.mubr.f32.gmra.mrb[22].mxu1 %v1244_v18 }
 0x135   : > { %1048 = vmatprep.mubr.msk.f32.mxu1 %vm1282_vm0, %v1283_v6 }
 0x137   : > { %v1246_v19 = vpop.eup %1245 }
 0x138   : > { %1049 = vmatmul.mubr.f32.gmra.mrb[24].mxu1 %v1246_v19  ;;  %v819_v19 = vld [vmem:[%s1692_s2 + $0x2] ss:$0 sm:$0xff] }
 0x139   : > { %1104 = vmatprep.mubr.msk.f32.mxu1 %vm1282_vm0, %v1283_v6 }
 0x1db   : > { %v497_v30 = vpop.f32.mrb[0].mxu1 }
 0x1dc   : > { %v498_v31 = vadd.f32 %v1614_v29, %v497_v30  ;;  %v1014_v32 = vpop.f32.mrb[1].mxu1 }
 0x1de   : > { %1247 = vtanh.f32 %v498_v31 }
 0x1df   : > { %v502_v33 = vpop.f32.mrb[2].mxu1 }
 0x1e0   : > { %v503_v34 = vadd.f32 %v1614_v29, %v502_v33  ;;  %v1017_v35 = vpop.f32.mrb[3].mxu1 }
 0x1e2   : > { %1249 = vtanh.f32 %v503_v34 }
 0x1e3   : > { %v507_v36 = vpop.f32.mrb[4].mxu1 }
 0x1e4   : > { %v508_v3 = vadd.f32 %v1614_v29, %v507_v36  ;;  %v1020_v37 = vpop.f32.mrb[5].mxu1 }
 0x1e6   : > { %1251 = vtanh.f32 %v508_v3 }
 0x1e7   : > { %v512_v38 = vpop.f32.mrb[6].mxu1 }
 0x1e8   : > { %v1248_v39 = vpop.eup %1247  ;;  %v513_v40 = vadd.f32 %v1614_v29, %v512_v38  ;;  %v1023_v41 = vpop.f32.mrb[7].mxu1 }
 0x1e9   : > { %1084 = vmatmul.mubr.f32.vlgmr.msra.gmra.mrb[26].mxu0 %v1248_v39 }
 0x1ea   : > { %1253 = vtanh.f32 %v513_v40  ;;  %1086 = vmatprep.mubr.msk.f32.mxu0 %vm1282_vm0, %v1283_v6 }
 0x1eb   : > { %v517_v42 = vpop.f32.mrb[8].mxu1 }
 0x1ec   : > { %v1250_v43 = vpop.eup %1249  ;;  %v518_v44 = vadd.f32 %v1614_v29, %v517_v42  ;;  %v1026_v45 = vpop.f32.mrb[9].mxu1 }
 0x1ed   : > { %1087 = vmatmul.mubr.f32.gmra.mrb[28].mxu0 %v1250_v43 }
 0x1ee   : > { %1255 = vtanh.f32 %v518_v44  ;;  %1089 = vmatprep.mubr.msk.f32.mxu0 %vm1282_vm0, %v1283_v6 }
 0x1ef   : > { %v522_v46 = vpop.f32.mrb[10].mxu1 }
 0x1f0   : > { %v1252_v47 = vpop.eup %1251  ;;  %v523_v48 = vadd.f32 %v1614_v29, %v522_v46  ;;  %v1029_v49 = vpop.f32.mrb[11].mxu1 }
 0x1f1   : > { %1090 = vmatmul.mubr.f32.gmra.mrb[30].mxu0 %v1252_v47 }
 0x1f2   : > { %1257 = vtanh.f32 %v523_v48  ;;  %1092 = vmatprep.mubr.msk.f32.mxu0 %vm1282_vm0, %v1283_v6 }
 0x1f3   : > { %v527_v50 = vpop.f32.mrb[12].mxu1 }
 0x1f4   : > { %v1254_v51 = vpop.eup %1253  ;;  %v528_v52 = vadd.f32 %v1614_v29, %v527_v50  ;;  %v1032_v53 = vpop.f32.mrb[13].mxu1 }
 0x1f5   : > { %1093 = vmatmul.mubr.f32.gmra.mrb[32].mxu0 %v1254_v51 }
 0x1f6   : > { %1259 = vtanh.f32 %v528_v52  ;;  %1095 = vmatprep.mubr.msk.f32.mxu0 %vm1282_vm0, %v1283_v6 }
 0x1f7   : > { %v532_v54 = vpop.f32.mrb[14].mxu1 }
 0x1f8   : > { %v1256_v55 = vpop.eup %1255  ;;  %v533_v56 = vadd.f32 %v1614_v29, %v532_v54  ;;  %v1035_v57 = vpop.f32.mrb[15].mxu1 }
 0x1f9   : > { %1096 = vmatmul.mubr.f32.gmra.mrb[34].mxu0 %v1256_v55 }
 0x1fa   : > { %1261 = vtanh.f32 %v533_v56  ;;  %1098 = vmatprep.mubr.msk.f32.mxu0 %vm1282_vm0, %v1283_v6 }
 0x1fb   : > { %v537_v58 = vpop.f32.mrb[16].mxu1 }
 0x1fc   : > { %v1258_v59 = vpop.eup %1257  ;;  %v538_v60 = vadd.f32 %v1614_v29, %v537_v58  ;;  %v1038_v61 = vpop.f32.mrb[17].mxu1 }
 0x1fd   : > { %1099 = vmatmul.mubr.f32.gmra.mrb[36].mxu0 %v1258_v59 }
 0x1fe   : > { %1263 = vtanh.f32 %v538_v60  ;;  %1101 = vmatprep.mubr.msk.f32.mxu0 %vm1282_vm0, %v1283_v6 }
 0x1ff   : > { %v542_v62 = vpop.f32.mrb[18].mxu1 }
 0x200   : > { %v1260_v63 = vpop.eup %1259  ;;  %v543_v0 = vadd.f32 %v1614_v29, %v542_v62  ;;  %v1041_v1 = vpop.f32.mrb[19].mxu1 }
 0x201   : > { %1102 = vmatmul.mubr.f32.gmra.mrb[38].mxu0 %v1260_v63 }
 0x202   : > { %1265 = vtanh.f32 %v543_v0 }
 0x203   : > { %v547_v2 = vpop.f32.mrb[20].mxu1 }
 0x204   : > { %v1262_v4 = vpop.eup %1261  ;;  %v548_v5 = vadd.f32 %v1614_v29, %v547_v2  ;;  %v1044_v7 = vpop.f32.mrb[21].mxu1 }
 0x205   : > { %1105 = vmatmul.mubr.f32.vlgmr.msra.gmra.mrb[26].mxu1 %v1262_v4 }
 0x206   : > { %1267 = vtanh.f32 %v548_v5  ;;  %1107 = vmatprep.mubr.msk.f32.mxu1 %vm1282_vm0, %v1283_v6 }
 0x207   : > { %v552_v8 = vpop.f32.mrb[22].mxu1 }
 0x208   : > { %v1264_v9 = vpop.eup %1263  ;;  %v553_v10 = vadd.f32 %v1614_v29, %v552_v8  ;;  %v1047_v11 = vpop.f32.mrb[23].mxu1 }
 0x209   : > { %1108 = vmatmul.mubr.f32.gmra.mrb[28].mxu1 %v1264_v9 }
 0x20a   : > { %1269 = vtanh.f32 %v553_v10  ;;  %1110 = vmatprep.mubr.msk.f32.mxu1 %vm1282_vm0, %v1283_v6 }
 0x20b   : > { %v557_v12 = vpop.f32.mrb[24].mxu1 }
 0x20c   : > { %v1266_v13 = vpop.eup %1265  ;;  %v558_v14 = vadd.f32 %v1614_v29, %v557_v12  ;;  %v1050_v15 = vpop.f32.mrb[25].mxu1 }
 0x20d   : > { %1111 = vmatmul.mubr.f32.gmra.mrb[30].mxu1 %v1266_v13 }
 0x20e   : > { %1271 = vtanh.f32 %v558_v14  ;;  %1113 = vmatprep.mubr.msk.f32.mxu1 %vm1282_vm0, %v1283_v6 }
 0x210   : > { %v1268_v16 = vpop.eup %1267 }
 0x211   : > { %1114 = vmatmul.mubr.f32.gmra.mrb[32].mxu1 %v1268_v16 }
 0x212   : > { %1116 = vmatprep.mubr.msk.f32.mxu1 %vm1282_vm0, %v1283_v6 }
 0x214   : > { %v1270_v17 = vpop.eup %1269 }
 0x215   : > { %1117 = vmatmul.mubr.f32.gmra.mrb[34].mxu1 %v1270_v17 }
 0x216   : > { %1119 = vmatprep.mubr.msk.f32.mxu1 %vm1282_vm0, %v1283_v6 }
 0x218   : > { %v1272_v18 = vpop.eup %1271 }
 0x219   : > { %1120 = vmatmul.mubr.f32.gmra.mrb[36].mxu1 %v1272_v18 }
 0x2bc   : > { %v644_v20 = vpop.f32.mrb[26].mxu0 }
 0x2bd   : > { %v645_v21 = vadd.f32 %v819_v19, %v644_v20  ;;  %v1085_v6 = vpop.f32.mrb[27].mxu0 }
 0x2bf   : > { %709 = vst.msk [vmem:[%s1659_s26] sm:$0xff] %vm708_vm2, %v645_v21 }
 0x2c0   : > { %v649_v22 = vpop.f32.mrb[28].mxu0 }
 0x2c1   : > { %v650_v23 = vadd.f32 %v819_v19, %v649_v22  ;;  %v1088_v24 = vpop.f32.mrb[29].mxu0 }
 0x2c3   : > { %710 = vst.msk [vmem:[%s1659_s26 + $0x8] sm:$0xff] %vm708_vm2, %v650_v23 }
 0x2c4   : > { %v654_v25 = vpop.f32.mrb[30].mxu0 }
 0x2c5   : > { %v655_v26 = vadd.f32 %v819_v19, %v654_v25  ;;  %v1091_v27 = vpop.f32.mrb[31].mxu0 }
 0x2c7   : > { %711 = vst.msk [vmem:[%s1659_s26 + $0x10] sm:$0xff] %vm708_vm2, %v655_v26 }
 0x2c8   : > { %v659_v28 = vpop.f32.mrb[32].mxu0 }
 0x2c9   : > { %v660_v29 = vadd.f32 %v819_v19, %v659_v28  ;;  %v1094_v30 = vpop.f32.mrb[33].mxu0 }
 0x2cb   : > { %712 = vst.msk [vmem:[%s1659_s26 + $0x18] sm:$0xff] %vm708_vm2, %v660_v29 }
 0x2cc   : > { %v664_v31 = vpop.f32.mrb[34].mxu0 }
 0x2cd   : > { %v665_v32 = vadd.f32 %v819_v19, %v664_v31  ;;  %v1097_v33 = vpop.f32.mrb[35].mxu0 }
 0x2cf   : > { %713 = vst.msk [vmem:[%s1659_s26 + $0x20] sm:$0xff] %vm708_vm2, %v665_v32 }
 0x2d0   : > { %v669_v34 = vpop.f32.mrb[36].mxu0 }
 0x2d1   : > { %v670_v35 = vadd.f32 %v819_v19, %v669_v34  ;;  %v1100_v36 = vpop.f32.mrb[37].mxu0 }
 0x2d3   : > { %714 = vst.msk [vmem:[%s1659_s26 + $0x28] sm:$0xff] %vm708_vm2, %v670_v35 }
 0x2d4   : > { %v674_v3 = vpop.f32.mrb[38].mxu0 }
 0x2d5   : > { %v675_v37 = vadd.f32 %v819_v19, %v674_v3  ;;  %v1103_v38 = vpop.f32.mrb[39].mxu0 }
 0x2d7   : > { %715 = vst.msk [vmem:[%s1659_s26 + $0x30] sm:$0xff] %vm708_vm2, %v675_v37 }
 0x2d8   : > { %v679_v39 = vpop.f32.mrb[26].mxu1 }
 0x2d9   : > { %v680_v40 = vadd.f32 %v819_v19, %v679_v39  ;;  %v1106_v41 = vpop.f32.mrb[27].mxu1 }
 0x2db   : > { %716 = vst.msk [vmem:[%s1659_s26 + $0x38] sm:$0xff] %vm708_vm2, %v680_v40 }
 0x2dc   : > { %v684_v42 = vpop.f32.mrb[28].mxu1 }
 0x2dd   : > { %v685_v43 = vadd.f32 %v819_v19, %v684_v42  ;;  %v1109_v44 = vpop.f32.mrb[29].mxu1 }
 0x2df   : > { %717 = vst.msk [vmem:[%s1659_s26 + $0x40] sm:$0xff] %vm708_vm2, %v685_v43 }
 0x2e0   : > { %v689_v45 = vpop.f32.mrb[30].mxu1 }
 0x2e1   : > { %v690_v46 = vadd.f32 %v819_v19, %v689_v45  ;;  %v1112_v47 = vpop.f32.mrb[31].mxu1 }
 0x2e3   : > { %718 = vst.msk [vmem:[%s1659_s26 + $0x48] sm:$0xff] %vm708_vm2, %v690_v46 }
 0x2e4   : > { %v694_v48 = vpop.f32.mrb[32].mxu1 }
 0x2e5   : > { %v695_v49 = vadd.f32 %v819_v19, %v694_v48  ;;  %v1115_v50 = vpop.f32.mrb[33].mxu1 }
 0x2e7   : > { %719 = vst.msk [vmem:[%s1659_s26 + $0x50] sm:$0xff] %vm708_vm2, %v695_v49 }
 0x2e8   : > { %v699_v51 = vpop.f32.mrb[34].mxu1 }
 0x2e9   : > { %v700_v52 = vadd.f32 %v819_v19, %v699_v51  ;;  %v1118_v53 = vpop.f32.mrb[35].mxu1 }
 0x2eb   : > { %720 = vst.msk [vmem:[%s1659_s26 + $0x58] sm:$0xff] %vm708_vm2, %v700_v52 }
 0x2ec   : > { %v704_v54 = vpop.f32.mrb[36].mxu1 }
 0x2ed   : > { %v705_v55 = vadd.f32 %v819_v19, %v704_v54  ;;  %v1121_v56 = vpop.f32.mrb[37].mxu1 }
 0x2ef   : > { %721 = vst.msk [vmem:[%s1659_s26 + $0x60] sm:$0xff] %vm708_vm2, %v705_v55 }
 0x2f0 PF: > { %s13_s12 = sadd.s32 1, %s1279_s12  }
 0x2f1   : > { %p10_p4 = scmp.ge.s32.totalorder %s13_s12, 4  }
 0x2f3   :  { %12 = sbr.rel (!%p10_p4) target bundleno = 1 (0x1), region = 64 }

</bundles_post_ra>
